<compile_context>
chip_gen: v5e
topology: v5e:2x2
jax: 0.10.0
libtpu: 0.0.40
codegen_flags: <defaults>
</compile_context>

<pallas_src>
import jax
import jax.numpy as jnp
import numpy as np
from jax.experimental import pallas as pl
from jax.experimental.pallas import tpu as pltpu


def gcn2_kernel(adj_ref, x_ref, pool_ref,
                w1_ref, b1_ref, wf_ref, bf_ref,
                out_ref):
    # adj_ref : (1, GN, GN)  bf16  block-diagonal normalized adjacency (G graphs)
    # x_ref   : (1, GN, Fin) bf16  stacked node features
    # pool_ref: (G, GN)      bf16  per-graph mean-pooling matrix (rows sum to 1)
    # w1/b1   : (Fin, H) bf16 / (1, H) f32      conv1 weight / bias
    # wf/bf   : (H, Cp) bf16 / (1, Cp) f32      folded W2@Wc / b2@Wc + bc (lane-padded)
    a = adj_ref[0]                      # (GN, GN)
    x = x_ref[0]                        # (GN, Fin)

    # GraphConv1 (norm='both'): aggregate first (Fin <= H), then weight, bias, ReLU.
    ax = jnp.dot(a, x, preferred_element_type=jnp.float32)                    # (GN, Fin) f32
    h = jnp.dot(ax.astype(jnp.bfloat16), w1_ref[...],
                preferred_element_type=jnp.float32) + b1_ref[...]             # (GN, H) f32
    h = jnp.maximum(h, 0.0).astype(jnp.bfloat16)                              # ReLU in f32, store bf16

    # GraphConv2 + mean_nodes + classifier, folded (all linear, exact):
    #   mean_g( A @ h @ W2 + b2 ) @ Wc + bc  ==  ((P @ A) @ h) @ (W2 @ Wc) + (b2 @ Wc + bc)
    pa = jnp.dot(pool_ref[...], a, preferred_element_type=jnp.float32)        # (G, GN) f32
    ph = jnp.dot(pa.astype(jnp.bfloat16), h,
                 preferred_element_type=jnp.float32)                          # (G, H)  f32
    out = jnp.dot(ph.astype(jnp.bfloat16), wf_ref[...],
                  preferred_element_type=jnp.float32) + bf_ref[...]           # (G, Cp) f32
    out_ref[0] = out


def gcn2_forward(adj_norm, x, params, *, target_rows=256):
    """adj_norm: (B, N, N) f32 normalized adjacency; x: (B, N, Fin) f32 node features."""
    B, N, Fin = x.shape
    w1, b1, w2, b2, wc, bc = params
    H = w1.shape[1]
    C = wc.shape[1]

    # ---- graph packing: G graphs per grid step (block-diagonal adjacency) ------------
    # Aim for ~256 packed rows (v6e/v7x MXU tile; also >=128 for v5e) but never more
    # than the batch itself.
    G = max(1, min(B, target_rows // N))
    NB = -(-B // G)                       # number of grid steps
    Bp = NB * G
    GN = G * N

    pad = Bp - B
    if pad:
        # dummy graphs: zero adjacency / zero features -> cannot leak into real graphs
        adj_norm = jnp.concatenate(
            [adj_norm, jnp.zeros((pad, N, N), adj_norm.dtype)], axis=0)
        x = jnp.concatenate([x, jnp.zeros((pad, N, Fin), x.dtype)], axis=0)

    # block-diagonal adjacency per block: (NB, G*N, G*N)
    adj_r = adj_norm.reshape(NB, G, N, N)
    eye_g = jnp.eye(G, dtype=adj_norm.dtype)
    adj_bd = jnp.einsum("bgij,gh->bgihj", adj_r, eye_g).reshape(NB, GN, GN)
    x_bd = x.reshape(NB, GN, Fin)

    # per-graph mean-pooling matrix P: (G, G*N), row g has 1/N over graph g's nodes.
    # TODO(synk): ragged graphs (variable node counts) need per-graph 1/n_g entries here
    #             (and masked adjacency) to exactly match dgl.mean_nodes on padded batches.
    pool = jnp.kron(jnp.eye(G, dtype=jnp.float32),
                    jnp.full((1, N), 1.0 / N, jnp.float32))

    # fold conv2 + classifier (both linear, consumed only through the node mean)
    wfold = w2 @ wc                        # (H, C)
    bfold = b2 @ wc + bc                   # (1, C)

    # lane-dense output: pad classes up to a multiple of 128, slice after the call
    Cp = ((C + 127) // 128) * 128
    wfold = jnp.pad(wfold, ((0, 0), (0, Cp - C)))
    bfold = jnp.pad(bfold, ((0, 0), (0, Cp - C)))

    # bf16 MXU operands, f32 accumulation (biases stay f32 for the VPU adds)
    bf16 = jnp.bfloat16
    adj_b = adj_bd.astype(bf16)
    x_b = x_bd.astype(bf16)
    pool_b = pool.astype(bf16)             # 1/N with N a power of two is exact in bf16
    w1_b = w1.astype(bf16)
    wf_b = wfold.astype(bf16)
    b1_f = b1.astype(jnp.float32)
    bf_f = bfold.astype(jnp.float32)

    def const_spec(shape):
        # whole-array block, constant index map -> fetched once, resident across the grid
        return pl.BlockSpec(shape, lambda nb: (0,) * len(shape))

    # advisory cost estimate for the XLA scheduler
    flops = 2 * NB * (GN * GN * Fin      # A @ X
                      + GN * Fin * H     # (AX) @ W1
                      + G * GN * GN      # P @ A
                      + G * GN * H       # (PA) @ h
                      + G * H * Cp)      # classifier (folded)
    bytes_accessed = int(
        (adj_b.size + x_b.size + pool_b.size + w1_b.size + wf_b.size) * 2
        + (b1_f.size + bf_f.size) * 4 + NB * G * Cp * 4)

    # VMEM budget: double-buffered per-step inputs + resident weights + output, capped
    # so the same config stays safe on v7x (64 MiB physical VMEM).
    blk_bytes = (2 * (GN * GN + GN * Fin) * 2            # adj + x, bf16, double-buffered
                 + (G * GN + Fin * H + H * Cp) * 2       # pool + weights, bf16
                 + (H + Cp) * 4                          # biases, f32
                 + 2 * G * Cp * 4)                       # output, f32, double-buffered
    vmem_limit = int(min(48 * 1024 * 1024, max(16 * 1024 * 1024, 4 * blk_bytes)))

    out = pl.pallas_call(
        gcn2_kernel,
        out_shape=jax.ShapeDtypeStruct((NB, G, Cp), jnp.float32),
        grid_spec=pltpu.PrefetchScalarGridSpec(
            num_scalar_prefetch=0,
            grid=(NB,),
            in_specs=[
                pl.BlockSpec((1, GN, GN), lambda nb: (nb, 0, 0)),    # packed adjacency
                pl.BlockSpec((1, GN, Fin), lambda nb: (nb, 0, 0)),   # packed node features
                const_spec((G, GN)),                                  # mean-pooling matrix
                const_spec((Fin, H)), const_spec((1, H)),             # conv1 W, b
                const_spec((H, Cp)), const_spec((1, Cp)),             # folded W2@Wc, b2@Wc+bc
            ],
            out_specs=pl.BlockSpec((1, G, Cp), lambda nb: (nb, 0, 0)),
        ),
        compiler_params=pltpu.CompilerParams(
            dimension_semantics=("parallel",),
            vmem_limit_bytes=vmem_limit),
        cost_estimate=pl.CostEstimate(
            flops=flops, transcendentals=0, bytes_accessed=bytes_accessed),
    )(adj_b, x_b, pool_b, w1_b, b1_f, wf_b, bf_f)

    return out.reshape(Bp, Cp)[:B, :C]


def reference_forward(adj_norm, x, params):
    """Pure-JAX f32 reference matching GCN2 / DGL GraphConv(norm='both') semantics."""
    w1, b1, w2, b2, wc, bc = params
    h = jnp.maximum(jnp.einsum("bij,bjf->bif", adj_norm, x @ w1) + b1, 0.0)
    h = jnp.einsum("bij,bjf->bif", adj_norm, h @ w2) + b2
    hg = jnp.mean(h, axis=1)               # dgl.mean_nodes
    return hg @ wc + bc


def make_params(key, in_feats, h_feats, num_classes):
    ks = jax.random.split(key, 6)

    def glorot(k, fan_in, fan_out):
        s = (6.0 / (fan_in + fan_out)) ** 0.5
        return jax.random.uniform(k, (fan_in, fan_out), jnp.float32, -s, s)

    w1 = glorot(ks[0], in_feats, h_feats)
    b1 = 0.05 * jax.random.normal(ks[1], (1, h_feats), jnp.float32)   # nonzero: exercises bias path
    w2 = glorot(ks[2], h_feats, h_feats)
    b2 = 0.05 * jax.random.normal(ks[3], (1, h_feats), jnp.float32)   # nonzero: exercises bias fold
    wc = glorot(ks[4], h_feats, num_classes)
    bc = 0.01 * jax.random.normal(ks[5], (1, num_classes), jnp.float32)
    return (w1, b1, w2, b2, wc, bc)


def build_normalized_adjacency(key, B, N):
    """Random undirected graphs with self loops; A_hat = D^{-1/2} A D^{-1/2}."""
    bits = jax.random.bernoulli(key, 0.3, (B, N, N)).astype(jnp.float32)
    a = jnp.maximum(bits, jnp.transpose(bits, (0, 2, 1)))           # symmetrize
    a = jnp.maximum(a, jnp.eye(N, dtype=jnp.float32)[None])         # self loops (no 0-degree)
    deg = jnp.clip(jnp.sum(a, axis=-1), 1.0, None)                  # (B, N)
    dinv = 1.0 / jnp.sqrt(deg)
    return a * dinv[:, :, None] * dinv[:, None, :]


if __name__ == "__main__":
    B, N = 2, 16                     # 2 graphs, 16 nodes each
    in_feats, h_feats, num_classes = 8, 32, 4

    root = jax.random.PRNGKey(0)
    k_adj, k_x, k_p = jax.random.split(root, 3)

    adj_norm = build_normalized_adjacency(k_adj, B, N)
    x = jax.random.normal(k_x, (B, N, in_feats), jnp.float32)
    params = make_params(k_p, in_feats, h_feats, num_classes)

    out = jax.block_until_ready(gcn2_forward(adj_norm, x, params))
    ref = jax.block_until_ready(reference_forward(adj_norm, x, params))

    # kernel uses bf16 MXU operands with f32 accumulation -> small bf16-level deviation
    np.testing.assert_allclose(np.asarray(out), np.asarray(ref), rtol=2e-2, atol=2e-2)

    print("KERNEL_OK")
</pallas_src>

<mosaic_0001>
module attributes {stable_mosaic.version = 11 : i64} {
  func.func @gcn2_kernel(%arg0: i32, %arg1: memref<1x32x32xbf16, #tpu.memory_space<vmem>>, %arg2: memref<1x32x8xbf16, #tpu.memory_space<vmem>>, %arg3: memref<2x32xbf16, #tpu.memory_space<vmem>>, %arg4: memref<8x32xbf16, #tpu.memory_space<vmem>>, %arg5: memref<1x32xf32, #tpu.memory_space<vmem>>, %arg6: memref<32x128xbf16, #tpu.memory_space<vmem>>, %arg7: memref<1x128xf32, #tpu.memory_space<vmem>>, %arg8: memref<1x2x128xf32, #tpu.memory_space<vmem>>) attributes {dimension_semantics = [#tpu.dimension_semantics<parallel>], iteration_bounds = array<i64: 1>, scalar_prefetch = 0 : i64, scratch_operands = 0 : i64, tpu.core_type = #tpu.core_type<tc>, window_params = [{transform_indices = @transform_0, window_bounds = array<i64: 1, 32, 32>}, {transform_indices = @transform_1, window_bounds = array<i64: 1, 32, 8>}, {pipeline_mode = #tpu.pipeline_mode<synchronous>, transform_indices = @transform_2, window_bounds = array<i64: 2, 32>}, {pipeline_mode = #tpu.pipeline_mode<synchronous>, transform_indices = @transform_3, window_bounds = array<i64: 8, 32>}, {pipeline_mode = #tpu.pipeline_mode<synchronous>, transform_indices = @transform_4, window_bounds = array<i64: 1, 32>}, {pipeline_mode = #tpu.pipeline_mode<synchronous>, transform_indices = @transform_5, window_bounds = array<i64: 32, 128>}, {pipeline_mode = #tpu.pipeline_mode<synchronous>, transform_indices = @transform_6, window_bounds = array<i64: 1, 128>}, {transform_indices = @transform_7, window_bounds = array<i64: 1, 2, 128>}]} {
    %c0 = arith.constant 0 : index
    %c0_0 = arith.constant 0 : index
    %c0_1 = arith.constant 0 : index
    %0 = vector.load %arg1[%c0, %c0_0, %c0_1] : memref<1x32x32xbf16, #tpu.memory_space<vmem>>, vector<1x32x32xbf16>
    %1 = vector.shape_cast %0 : vector<1x32x32xbf16> to vector<32x32xbf16>
    %c0_2 = arith.constant 0 : index
    %c0_3 = arith.constant 0 : index
    %c0_4 = arith.constant 0 : index
    %2 = vector.load %arg2[%c0_2, %c0_3, %c0_4] : memref<1x32x8xbf16, #tpu.memory_space<vmem>>, vector<1x32x8xbf16>
    %3 = vector.shape_cast %2 : vector<1x32x8xbf16> to vector<32x8xbf16>
    %cst = arith.constant dense<0.000000e+00> : vector<32x8xf32>
    %4 = tpu.matmul %1, %3, %cst {dimension_numbers = #tpu.dot_dimension_numbers<[1], [0], [0], [1], [0, 0, 1, 1], [], []>} : vector<32x32xbf16>, vector<32x8xbf16>, vector<32x8xf32> -> vector<32x8xf32>
    %5 = arith.truncf %4 : vector<32x8xf32> to vector<32x8xbf16>
    %c0_5 = arith.constant 0 : index
    %c0_6 = arith.constant 0 : index
    %6 = vector.load %arg4[%c0_5, %c0_6] : memref<8x32xbf16, #tpu.memory_space<vmem>>, vector<8x32xbf16>
    %cst_7 = arith.constant dense<0.000000e+00> : vector<32x32xf32>
    %7 = tpu.matmul %5, %6, %cst_7 {dimension_numbers = #tpu.dot_dimension_numbers<[1], [0], [0], [1], [0, 0, 1, 1], [], []>} : vector<32x8xbf16>, vector<8x32xbf16>, vector<32x32xf32> -> vector<32x32xf32>
    %c0_8 = arith.constant 0 : index
    %c0_9 = arith.constant 0 : index
    %8 = vector.load %arg5[%c0_8, %c0_9] : memref<1x32xf32, #tpu.memory_space<vmem>>, vector<1x32xf32>
    %9 = vector.broadcast %8 : vector<1x32xf32> to vector<32x32xf32>
    %10 = arith.addf %7, %9 : vector<32x32xf32>
    %cst_10 = arith.constant 0.000000e+00 : f32
    %11 = vector.broadcast %cst_10 : f32 to vector<32x32xf32>
    %12 = arith.maximumf %10, %11 : vector<32x32xf32>
    %13 = arith.truncf %12 : vector<32x32xf32> to vector<32x32xbf16>
    %c0_11 = arith.constant 0 : index
    %c0_12 = arith.constant 0 : index
    %14 = vector.load %arg3[%c0_11, %c0_12] : memref<2x32xbf16, #tpu.memory_space<vmem>>, vector<2x32xbf16>
    %cst_13 = arith.constant dense<0.000000e+00> : vector<2x32xf32>
    %15 = tpu.matmul %14, %1, %cst_13 {dimension_numbers = #tpu.dot_dimension_numbers<[1], [0], [0], [1], [0, 0, 1, 1], [], []>} : vector<2x32xbf16>, vector<32x32xbf16>, vector<2x32xf32> -> vector<2x32xf32>
    %16 = arith.truncf %15 : vector<2x32xf32> to vector<2x32xbf16>
    %cst_14 = arith.constant dense<0.000000e+00> : vector<2x32xf32>
    %17 = tpu.matmul %16, %13, %cst_14 {dimension_numbers = #tpu.dot_dimension_numbers<[1], [0], [0], [1], [0, 0, 1, 1], [], []>} : vector<2x32xbf16>, vector<32x32xbf16>, vector<2x32xf32> -> vector<2x32xf32>
    %18 = arith.truncf %17 : vector<2x32xf32> to vector<2x32xbf16>
    %c0_15 = arith.constant 0 : index
    %c0_16 = arith.constant 0 : index
    %19 = vector.load %arg6[%c0_15, %c0_16] : memref<32x128xbf16, #tpu.memory_space<vmem>>, vector<32x128xbf16>
    %cst_17 = arith.constant dense<0.000000e+00> : vector<2x128xf32>
    %20 = tpu.matmul %18, %19, %cst_17 {dimension_numbers = #tpu.dot_dimension_numbers<[1], [0], [0], [1], [0, 0, 1, 1], [], []>} : vector<2x32xbf16>, vector<32x128xbf16>, vector<2x128xf32> -> vector<2x128xf32>
    %c0_18 = arith.constant 0 : index
    %c0_19 = arith.constant 0 : index
    %21 = vector.load %arg7[%c0_18, %c0_19] : memref<1x128xf32, #tpu.memory_space<vmem>>, vector<1x128xf32>
    %22 = vector.broadcast %21 : vector<1x128xf32> to vector<2x128xf32>
    %23 = arith.addf %20, %22 : vector<2x128xf32>
    %c0_20 = arith.constant 0 : index
    %c0_21 = arith.constant 0 : index
    %c0_22 = arith.constant 0 : index
    %24 = vector.load %arg8[%c0_20, %c0_21, %c0_22] : memref<1x2x128xf32, #tpu.memory_space<vmem>>, vector<1x2x128xf32>
    %25 = vector.shape_cast %24 : vector<1x2x128xf32> to vector<2x128xf32>
    %26 = vector.shape_cast %23 : vector<2x128xf32> to vector<1x2x128xf32>
    tpu.vector_store %arg8[%c0_20, %c0_21, %c0_22], %26 {strides = array<i32>} : memref<1x2x128xf32, #tpu.memory_space<vmem>>, vector<1x2x128xf32>,
    return
  }
  func.func @transform_0(%arg0: i32) -> (i32, i32, i32) {
    %c0_i32 = arith.constant 0 : i32
    %c0_i32_0 = arith.constant 0 : i32
    %c0_i32_1 = arith.constant 0 : i32
    return %arg0, %c0_i32, %c0_i32_0 : i32, i32, i32
  }
  func.func @transform_1(%arg0: i32) -> (i32, i32, i32) {
    %c0_i32 = arith.constant 0 : i32
    %c0_i32_0 = arith.constant 0 : i32
    %c0_i32_1 = arith.constant 0 : i32
    return %arg0, %c0_i32, %c0_i32_0 : i32, i32, i32
  }
  func.func @transform_2(%arg0: i32) -> (i32, i32) {
    %c0_i32 = arith.constant 0 : i32
    %c0_i32_0 = arith.constant 0 : i32
    %c0_i32_1 = arith.constant 0 : i32
    return %c0_i32, %c0_i32_0 : i32, i32
  }
  func.func @transform_3(%arg0: i32) -> (i32, i32) {
    %c0_i32 = arith.constant 0 : i32
    %c0_i32_0 = arith.constant 0 : i32
    %c0_i32_1 = arith.constant 0 : i32
    return %c0_i32, %c0_i32_0 : i32, i32
  }
  func.func @transform_4(%arg0: i32) -> (i32, i32) {
    %c0_i32 = arith.constant 0 : i32
    %c0_i32_0 = arith.constant 0 : i32
    %c0_i32_1 = arith.constant 0 : i32
    return %c0_i32, %c0_i32_0 : i32, i32
  }
  func.func @transform_5(%arg0: i32) -> (i32, i32) {
    %c0_i32 = arith.constant 0 : i32
    %c0_i32_0 = arith.constant 0 : i32
    %c0_i32_1 = arith.constant 0 : i32
    return %c0_i32, %c0_i32_0 : i32, i32
  }
  func.func @transform_6(%arg0: i32) -> (i32, i32) {
    %c0_i32 = arith.constant 0 : i32
    %c0_i32_0 = arith.constant 0 : i32
    %c0_i32_1 = arith.constant 0 : i32
    return %c0_i32, %c0_i32_0 : i32, i32
  }
  func.func @transform_7(%arg0: i32) -> (i32, i32, i32) {
    %c0_i32 = arith.constant 0 : i32
    %c0_i32_0 = arith.constant 0 : i32
    %c0_i32_1 = arith.constant 0 : i32
    return %arg0, %c0_i32, %c0_i32_0 : i32, i32, i32
  }
}

</mosaic_0001>

<bundles_post_ra>
// kernel: tpu_custom_call.1
= control target key start
LH: loop header
LB: loop body
LE: loop exit
PB: predicated region body
PF: predicated region fallthrough
CT: control target
= control target key end

     0   :  { %12 = vsyncpa [#allocation3], 0  ;;  %s408_s0 = inlined_call_operand.vmem [shape: bf16[1,32,32], index: 0, kind: input, shape index: {}]   ;;  %s409_s1 = inlined_call_operand.vmem [shape: bf16[1,32,8], index: 1, kind: input, shape index: {}]   ;;  %s410_s2 = inlined_call_operand.vmem [shape: bf16[2,32], index: 2, kind: input, shape index: {}]   ;;  %s411_s3 = inlined_call_operand.vmem [shape: bf16[8,32], index: 3, kind: input, shape index: {}]   ;;  %s412_s4 = inlined_call_operand.vmem [shape: f32[1,32], index: 4, kind: input, shape index: {}]   ;;  %s413_s5 = inlined_call_operand.hbm [shape: bf16[32,128], index: 5, kind: input, shape index: {}]   ;;  %s414_s6 = inlined_call_operand.vmem [shape: f32[1,128], index: 6, kind: input, shape index: {}]   ;;  %s415_s7 = inlined_call_operand.hbm [shape: f32[1,2,128], index: 7, kind: output, shape index: {}]  }
   0x1   :  { %13 = vsyncpa [#allocation4], 0  ;;  %s28_s26 = sshll.u32 %s413_s5, 4  ;;  %s329_s27 = smov [#allocation2]   ;;  %s29_s26 = int_to_ptr.hbm [resolvable:$true] %s28_s26 }
   0x2   :  { %s30_s28 = sshll.u32 %s329_s27, 4  ;;  %s330_s29 = smov 64   ;;  %s31_s28 = int_to_ptr.vmem [resolvable:$true] %s30_s28 }
   0x3   :  { %s331_s30 = smov 4  }
   0x4   :  { %36 = dma.hbm_to_vmem [thread:$0]  %s29_s26, 256, %s31_s28, [#allocation3], %s330_s29, %s330_s29, %s331_s30  }
   0x5   :  { %325 = dma.done.wait [#allocation3], 256  }
   0x6   :  { %326 = vsyncadd [#allocation3], 4294967040  ;;  %v268_v0 = vld [vmem:[%s409_s1 + $0x8] sm:$0xff]  ;;  %v267_v2 = vld [vmem:[%s409_s1] sm:$0xff]  ;;  %vm74_vm0 = vcmask 261120   ;;  %vm114_vm1 = vcmask 1043456  }
   0x7   :  { %v266_v1 = vld [vmem:[%s408_s0 + $0x8] sm:$0xff]  ;;  %87 = vmatpush.bf16.msra.mxu0 %v268_v0  ;;  %v265_v3 = vld [vmem:[%s408_s0] sm:$0xff]  ;;  %vm107_vm2 = vcmask 64512   ;;  %s332_s18 = smov [#allocation5]   ;;  %s224_s22 = sshll.u32 %s415_s7, 4  ;;  %s225_s22 = int_to_ptr.hbm [resolvable:$true] %s224_s22 }
   0x8   :  { %155 = vmatpush.bf16.msra.mxu2 %v266_v1  ;;  %v102_v4 = vld [vmem:[%s411_s3] sm:$0xf]  ;;  %v270_v16 = vld [vmem:[#allocation2 + $0x8] sm:$0xff]  ;;  %s222_s19 = sshll.u32 %s332_s18, 4  ;;  %s223_s19 = int_to_ptr.vmem [resolvable:$true] %s222_s19 }
   0x9   :  { %v116_v5 = vsel %vm114_vm1, %v102_v4, 0  ;;  %v143_v6 = vld [vmem:[%s410_s2] sm:$0x1] }
   0xa   :  { %125 = vmatpush.bf16.msra.mxu1 %v116_v5  ;;  %v269_v18 = vld [vmem:[#allocation2] sm:$0xff] }
   0xb   :  { %88 = vmatpush.bf16.msra.mxu0 %v267_v2  ;;  %v275_v20 = vld [vmem:[%s412_s4] ss:$0 sm:$0xff] }
   0xc   :  { %156 = vmatpush.bf16.msra.mxu2 %v265_v3  ;;  %v276_v36 = vld [vmem:[%s414_s6] ss:$0 sm:$0xff] }
   0xe   :  { %250 = vmatmul.msk.bf16.vlgmr.msra.gmra.mxu0 %vm74_vm0, %v265_v3 }
   0xf   :  { %254 = vmatmul.msk.bf16.vlgmr.msra.gmra.mxu2 %vm74_vm0, %v143_v6 }
  0x10   :  { %209 = vmatpush.bf16.msrb.mxu2 %v270_v16 }
  0x14   :  { %210 = vmatpush.bf16.msrb.mxu2 %v269_v18 }
  0x1e   :  { %251 = vmatmul.msk.bf16.gmra.mxu0 %vm74_vm0, %v266_v1 }
  0x8b   :  { %v90_v7 = vpop.f32.mrf.mxu0 }
  0x92   :  { %v158_v13 = vpop.f32.mrf.mxu2 }
  0x93   :  { %v92_v8 = vpop.f32.mrf.mxu0  ;;  %v162_v32 = vpack.c.bf16 %v158_v13, %v158_v13 }
  0x94   :  { %v100_v9 = vpack.c.bf16 %v92_v8, %v90_v7 }
  0x96   :  { %252 = vmatmul.msk.bf16.vlgmr.msra.gmra.mxu1 %vm107_vm2, %v100_v9 }
  0x9a   :  { %v160_v15 = vpop.f32.mrf.mxu2 }
  0x9b   :  { %v95_v10 = vpop.f32.mrf.mxu0 }
  0xa3   :  { %v97_v11 = vpop.f32.mrf.mxu0 }
  0xa4   :  { %v101_v12 = vpack.c.bf16 %v97_v11, %v95_v10 }
  0xa6   :  { %253 = vmatmul.msk.bf16.gmra.mxu1 %vm107_vm2, %v101_v12 }
 0x113   :  { %v127_v14 = vpop.f32.mrf.mxu1 }
 0x114   :  { %v128_v25 = vadd.f32 %v275_v20, %v127_v14 }
 0x116   :  { %v137_v30 = vmax.f32 %v128_v25, 0.0 }
 0x11b   :  { %v129_v17 = vpop.f32.mrf.mxu1 }
 0x11c   :  { %v130_v23 = vadd.f32 %v275_v20, %v129_v17 }
 0x11e   :  { %v138_v28 = vmax.f32 %v130_v23, 0.0 }
 0x120   :  { %v141_v31 = vpack.c.bf16 %v138_v28, %v137_v30 }
 0x123   :  { %v132_v19 = vpop.f32.mrf.mxu1 }
 0x124   :  { %v133_v21 = vadd.f32 %v275_v20, %v132_v19 }
 0x126   :  { %v139_v26 = vmax.f32 %v133_v21, 0.0 }
 0x12b   :  { %v134_v22 = vpop.f32.mrf.mxu1 }
 0x12c   :  { %v135_v24 = vadd.f32 %v275_v20, %v134_v22 }
 0x12e   :  { %v140_v27 = vmax.f32 %v135_v24, 0.0 }
 0x130   :  { %v142_v29 = vpack.c.bf16 %v140_v27, %v139_v26 }
 0x132   :  { %172 = vmatpush.bf16.msra.mxu3 %v142_v29 }
 0x136   :  { %173 = vmatpush.bf16.msra.mxu3 %v141_v31 }
 0x139   :  { %255 = vmatmul.msk.bf16.vlgmr.msra.gmra.mxu3 %vm74_vm0, %v162_v32 }
 0x1bc   :  { %v175_v33 = vpop.f32.mrf.mxu3 }
 0x1bd   :  { %v179_v34 = vpack.c.bf16 %v175_v33, %v175_v33 }
 0x1bf   :  { %264 = vmatmul.msk.bf16.vlgmr.msrb.gmra.mxu2 %vm74_vm0, %v179_v34 }
 0x1c4   :  { %v177_v35 = vpop.f32.mrf.mxu3 }
 0x242   :  { %v212_v37 = vpop.f32.mrf.mxu2 }
 0x243   :  { %v213_v38 = vadd.f32 %v276_v36, %v212_v37 }
 0x245   :  { %216 = vst [vmem:[#allocation5] sm:$0x3] %v213_v38 }
 0x246   :  { %227 = dma.vmem_to_hbm [thread:$0]  %s223_s19, 32, %s225_s22, [#allocation4]  }
 0x24a   :  { %v214_v39 = vpop.f32.mrf.mxu2 }
 0x24b   :  { %327 = dma.done.wait [#allocation4], 32  }
 0x24c   :  { %328 = vsyncadd [#allocation4], 4294967264 }
 0x24d   :  { %232 = vsyncpa [#allocation3], 1 }
 0x24e   :  { %233 = vsyncpa [#allocation4], 1 }

</bundles_post_ra>
